<compile_context>
chip_gen: v7x
topology: tpu7x:2x2x1
jax: 0.10.0
libtpu: 0.0.40
codegen_flags: <defaults>
</compile_context>

<pallas_src>
import jax
import jax.numpy as jnp
from jax.experimental import pallas as pl
from jax.experimental.pallas import tpu as pltpu

C_IN, C_OUT, KH, KW = 3, 3, 2, 2


def _pick_row_tile(H, W):
    """Row tile h (multiple of 8, or the full H), ~<= 4MB of HBM per grid step."""
    # bytes moved per grid step: input 3*h*2W*4 + output 3*h*4W*4 = 72*h*W
    h_cap = max(8, (4 << 20) // (72 * max(W, 1)))
    if H <= h_cap:
        return H
    return (h_cap // 8) * 8  # sublane-aligned; partial last block is masked


def _upsample_kernel(xs_ref, wb_ref, o_ref):
    # xs_ref: (1, C_IN, h, 2W)  input with each column duplicated onto lanes 2j, 2j+1
    # wb_ref: (C_IN*C_OUT*KH + C_OUT, 2W) lane-periodic weight rows + bias rows
    # o_ref : (1, C_OUT, h, KH*2W) -- [ki=0 tap | ki=1 tap] concatenated on lanes
    x = [xs_ref[0, ci] for ci in range(C_IN)]          # each (h, 2W), f32 on the VPU
    nb = C_IN * C_OUT * KH                             # offset of the bias rows
    for co in range(C_OUT):
        taps = []
        for ki in range(KH):
            r0 = (0 * C_OUT + co) * KH + ki
            acc = x[0] * wb_ref[r0:r0 + 1]             # (h,2W) * (1,2W) broadcast
            for ci in range(1, C_IN):
                r = (ci * C_OUT + co) * KH + ki
                acc = acc + x[ci] * wb_ref[r:r + 1]
            acc = acc + wb_ref[nb + co:nb + co + 1]    # + bias[co]
            taps.append(acc)
        # dense (h, 4W) store; reshaping (H, 2*2W) -> (2H, 2W) outside is free.
        o_ref[0, co] = jnp.concatenate(taps, axis=-1).astype(o_ref.dtype)


def upsample_pallas(x_nchw, weight, bias, *, row_tile=None):
    """ConvTranspose2d(3, 3, 2, stride=2, padding=0) forward.

    x_nchw : (N, 3, H, W)
    weight : (3, 3, 2, 2)   -- PyTorch ConvTranspose2d weight layout (Cin,Cout,KH,KW)
    bias   : (3,)
    returns: (N, 3, 2H, 2W)
    """
    N, C, H, W = x_nchw.shape
    assert C == C_IN
    W2, W4 = KW * W, KH * KW * W

    # Cheap XLA pre-pass: duplicate each input column (x[..., j] -> lanes 2j, 2j+1).
    xs = jnp.repeat(x_nchw, KW, axis=3)                          # (N, 3, H, 2W)

    # Lane-periodic weight/bias table: row (ci*C_OUT+co)*KH+ki holds
    # [w(ci,co,ki,0), w(ci,co,ki,1), w0, w1, ...]; last C_OUT rows hold bias[co].
    wrows = weight.reshape(C_IN * C_OUT * KH, KW)
    wlane = jnp.tile(wrows, (1, W)).astype(x_nchw.dtype)         # (18, 2W)
    blane = jnp.tile(bias.reshape(C_OUT, 1), (1, W2)).astype(x_nchw.dtype)  # (3, 2W)
    wb = jnp.concatenate([wlane, blane], axis=0)                 # (21, 2W)

    h = row_tile if row_tile is not None else _pick_row_tile(H, W)
    grid = (N, pl.cdiv(H, h))

    out4 = pl.pallas_call(
        _upsample_kernel,
        out_shape=jax.ShapeDtypeStruct((N, C_OUT, H, W4), x_nchw.dtype),
        grid_spec=pltpu.PrefetchScalarGridSpec(
            num_scalar_prefetch=0,
            grid=grid,
            in_specs=[
                pl.BlockSpec((1, C_IN, h, W2), lambda n, r: (n, 0, r, 0)),
                # constant block index -> fetched once, stays resident in VMEM
                pl.BlockSpec((C_IN * C_OUT * KH + C_OUT, W2), lambda n, r: (0, 0)),
            ],
            out_specs=pl.BlockSpec((1, C_OUT, h, W4), lambda n, r: (n, 0, r, 0)),
        ),
        compiler_params=pltpu.CompilerParams(
            dimension_semantics=("parallel", "parallel"),
            vmem_limit_bytes=32 * 1024 * 1024,
        ),
    )(xs, wb)

    # Free contiguous reshape: (N, C, H, KH*2W) -> (N, C, 2H, 2W).
    return out4.reshape(N, C_OUT, KH * H, KW * W)


def upsample_reference(x_nchw, weight, bias):
    # Pure-jnp reference of ConvTranspose2d(3,3,2,stride=2,padding=0), exact f32.
    N, C, H, W = x_nchw.shape
    y = jnp.einsum(
        "ncij,codk->noidjk", x_nchw, weight,
        precision=jax.lax.Precision.HIGHEST,
    )  # (N, C_OUT, H, KH, W, KW)
    y = y.reshape(N, C_OUT, H * KH, W * KW)
    return y + bias.reshape(1, C_OUT, 1, 1)


if __name__ == "__main__":
    key = jax.random.PRNGKey(0)
    kx, kw, kb, kx2 = jax.random.split(key, 4)

    weight = jax.random.normal(kw, (C_IN, C_OUT, KH, KW), dtype=jnp.float32) * 0.1
    bias = jax.random.normal(kb, (C_OUT,), dtype=jnp.float32) * 0.1

    # Case 1: small shape consistent with the module's forward (C must be 3).
    N, H, W = 2, 16, 16
    x = jax.random.normal(kx, (N, C_IN, H, W), dtype=jnp.float32)
    out = jax.block_until_ready(upsample_pallas(x, weight, bias))
    ref = upsample_reference(x, weight, bias)
    assert out.shape == (N, C_OUT, 2 * H, 2 * W)
    assert jnp.allclose(out, ref, atol=1e-5, rtol=1e-5), "mismatch vs reference (case 1)"

    # Case 2: H not divisible by the row tile -> exercises the masked partial block.
    N2, H2, W2_ = 1, 20, 16
    x2 = jax.random.normal(kx2, (N2, C_IN, H2, W2_), dtype=jnp.float32)
    out2 = jax.block_until_ready(upsample_pallas(x2, weight, bias, row_tile=8))
    ref2 = upsample_reference(x2, weight, bias)
    assert out2.shape == (N2, C_OUT, 2 * H2, 2 * W2_)
    assert jnp.allclose(out2, ref2, atol=1e-5, rtol=1e-5), "mismatch vs reference (case 2)"

    print("KERNEL_OK")
</pallas_src>

<mosaic_0001>
module attributes {stable_mosaic.version = 11 : i64} {
  func.func @_upsample_kernel(%arg0: i32, %arg1: i32, %arg2: memref<1x3x16x32xf32, #tpu.memory_space<vmem>>, %arg3: memref<21x32xf32, #tpu.memory_space<vmem>>, %arg4: memref<1x3x16x64xf32, #tpu.memory_space<vmem>>) attributes {dimension_semantics = [#tpu.dimension_semantics<parallel>, #tpu.dimension_semantics<parallel>], iteration_bounds = array<i64: 2, 1>, scalar_prefetch = 0 : i64, scratch_operands = 0 : i64, tpu.core_type = #tpu.core_type<tc>, window_params = [{transform_indices = @transform_0, window_bounds = array<i64: 1, 3, 16, 32>}, {pipeline_mode = #tpu.pipeline_mode<synchronous>, transform_indices = @transform_1, window_bounds = array<i64: 21, 32>}, {transform_indices = @transform_2, window_bounds = array<i64: 1, 3, 16, 64>}]} {
    %c0 = arith.constant 0 : index
    %c0_0 = arith.constant 0 : index
    %c0_1 = arith.constant 0 : index
    %c0_2 = arith.constant 0 : index
    %0 = vector.load %arg2[%c0, %c0_0, %c0_1, %c0_2] : memref<1x3x16x32xf32, #tpu.memory_space<vmem>>, vector<1x1x16x32xf32>
    %1 = vector.shape_cast %0 : vector<1x1x16x32xf32> to vector<16x32xf32>
    %c0_3 = arith.constant 0 : index
    %c1 = arith.constant 1 : index
    %c0_4 = arith.constant 0 : index
    %c0_5 = arith.constant 0 : index
    %2 = vector.load %arg2[%c0_3, %c1, %c0_4, %c0_5] : memref<1x3x16x32xf32, #tpu.memory_space<vmem>>, vector<1x1x16x32xf32>
    %3 = vector.shape_cast %2 : vector<1x1x16x32xf32> to vector<16x32xf32>
    %c0_6 = arith.constant 0 : index
    %c2 = arith.constant 2 : index
    %c0_7 = arith.constant 0 : index
    %c0_8 = arith.constant 0 : index
    %4 = vector.load %arg2[%c0_6, %c2, %c0_7, %c0_8] : memref<1x3x16x32xf32, #tpu.memory_space<vmem>>, vector<1x1x16x32xf32>
    %5 = vector.shape_cast %4 : vector<1x1x16x32xf32> to vector<16x32xf32>
    %c0_9 = arith.constant 0 : index
    %c0_10 = arith.constant 0 : index
    %6 = vector.load %arg3[%c0_9, %c0_10] : memref<21x32xf32, #tpu.memory_space<vmem>>, vector<1x32xf32>
    %7 = vector.broadcast %6 : vector<1x32xf32> to vector<16x32xf32>
    %8 = arith.mulf %1, %7 : vector<16x32xf32>
    %c6 = arith.constant 6 : index
    %c0_11 = arith.constant 0 : index
    %9 = vector.load %arg3[%c6, %c0_11] : memref<21x32xf32, #tpu.memory_space<vmem>>, vector<1x32xf32>
    %10 = vector.broadcast %9 : vector<1x32xf32> to vector<16x32xf32>
    %11 = arith.mulf %3, %10 : vector<16x32xf32>
    %12 = arith.addf %8, %11 : vector<16x32xf32>
    %c12 = arith.constant 12 : index
    %c0_12 = arith.constant 0 : index
    %13 = vector.load %arg3[%c12, %c0_12] : memref<21x32xf32, #tpu.memory_space<vmem>>, vector<1x32xf32>
    %14 = vector.broadcast %13 : vector<1x32xf32> to vector<16x32xf32>
    %15 = arith.mulf %5, %14 : vector<16x32xf32>
    %16 = arith.addf %12, %15 : vector<16x32xf32>
    %c18 = arith.constant 18 : index
    %c0_13 = arith.constant 0 : index
    %17 = vector.load %arg3[%c18, %c0_13] : memref<21x32xf32, #tpu.memory_space<vmem>>, vector<1x32xf32>
    %18 = vector.broadcast %17 : vector<1x32xf32> to vector<16x32xf32>
    %19 = arith.addf %16, %18 : vector<16x32xf32>
    %c1_14 = arith.constant 1 : index
    %c0_15 = arith.constant 0 : index
    %20 = vector.load %arg3[%c1_14, %c0_15] : memref<21x32xf32, #tpu.memory_space<vmem>>, vector<1x32xf32>
    %21 = vector.broadcast %20 : vector<1x32xf32> to vector<16x32xf32>
    %22 = arith.mulf %1, %21 : vector<16x32xf32>
    %c7 = arith.constant 7 : index
    %c0_16 = arith.constant 0 : index
    %23 = vector.load %arg3[%c7, %c0_16] : memref<21x32xf32, #tpu.memory_space<vmem>>, vector<1x32xf32>
    %24 = vector.broadcast %23 : vector<1x32xf32> to vector<16x32xf32>
    %25 = arith.mulf %3, %24 : vector<16x32xf32>
    %26 = arith.addf %22, %25 : vector<16x32xf32>
    %c13 = arith.constant 13 : index
    %c0_17 = arith.constant 0 : index
    %27 = vector.load %arg3[%c13, %c0_17] : memref<21x32xf32, #tpu.memory_space<vmem>>, vector<1x32xf32>
    %28 = vector.broadcast %27 : vector<1x32xf32> to vector<16x32xf32>
    %29 = arith.mulf %5, %28 : vector<16x32xf32>
    %30 = arith.addf %26, %29 : vector<16x32xf32>
    %c18_18 = arith.constant 18 : index
    %c0_19 = arith.constant 0 : index
    %31 = vector.load %arg3[%c18_18, %c0_19] : memref<21x32xf32, #tpu.memory_space<vmem>>, vector<1x32xf32>
    %32 = vector.broadcast %31 : vector<1x32xf32> to vector<16x32xf32>
    %33 = arith.addf %30, %32 : vector<16x32xf32>
    %34 = tpu.concatenate %19, %33 in 1 : vector<16x32xf32>, vector<16x32xf32> -> vector<16x64xf32>
    %c0_20 = arith.constant 0 : index
    %c0_21 = arith.constant 0 : index
    %c0_22 = arith.constant 0 : index
    %c0_23 = arith.constant 0 : index
    %35 = vector.load %arg4[%c0_20, %c0_21, %c0_22, %c0_23] : memref<1x3x16x64xf32, #tpu.memory_space<vmem>>, vector<1x1x16x64xf32>
    %36 = vector.shape_cast %35 : vector<1x1x16x64xf32> to vector<16x64xf32>
    %37 = vector.shape_cast %34 : vector<16x64xf32> to vector<1x1x16x64xf32>
    tpu.vector_store %arg4[%c0_20, %c0_21, %c0_22, %c0_23], %37 {strides = array<i32>} : memref<1x3x16x64xf32, #tpu.memory_space<vmem>>, vector<1x1x16x64xf32>,
    %c2_24 = arith.constant 2 : index
    %c0_25 = arith.constant 0 : index
    %38 = vector.load %arg3[%c2_24, %c0_25] : memref<21x32xf32, #tpu.memory_space<vmem>>, vector<1x32xf32>
    %39 = vector.broadcast %38 : vector<1x32xf32> to vector<16x32xf32>
    %40 = arith.mulf %1, %39 : vector<16x32xf32>
    %c8 = arith.constant 8 : index
    %c0_26 = arith.constant 0 : index
    %41 = vector.load %arg3[%c8, %c0_26] : memref<21x32xf32, #tpu.memory_space<vmem>>, vector<1x32xf32>
    %42 = vector.broadcast %41 : vector<1x32xf32> to vector<16x32xf32>
    %43 = arith.mulf %3, %42 : vector<16x32xf32>
    %44 = arith.addf %40, %43 : vector<16x32xf32>
    %c14 = arith.constant 14 : index
    %c0_27 = arith.constant 0 : index
    %45 = vector.load %arg3[%c14, %c0_27] : memref<21x32xf32, #tpu.memory_space<vmem>>, vector<1x32xf32>
    %46 = vector.broadcast %45 : vector<1x32xf32> to vector<16x32xf32>
    %47 = arith.mulf %5, %46 : vector<16x32xf32>
    %48 = arith.addf %44, %47 : vector<16x32xf32>
    %c19 = arith.constant 19 : index
    %c0_28 = arith.constant 0 : index
    %49 = vector.load %arg3[%c19, %c0_28] : memref<21x32xf32, #tpu.memory_space<vmem>>, vector<1x32xf32>
    %50 = vector.broadcast %49 : vector<1x32xf32> to vector<16x32xf32>
    %51 = arith.addf %48, %50 : vector<16x32xf32>
    %c3 = arith.constant 3 : index
    %c0_29 = arith.constant 0 : index
    %52 = vector.load %arg3[%c3, %c0_29] : memref<21x32xf32, #tpu.memory_space<vmem>>, vector<1x32xf32>
    %53 = vector.broadcast %52 : vector<1x32xf32> to vector<16x32xf32>
    %54 = arith.mulf %1, %53 : vector<16x32xf32>
    %c9 = arith.constant 9 : index
    %c0_30 = arith.constant 0 : index
    %55 = vector.load %arg3[%c9, %c0_30] : memref<21x32xf32, #tpu.memory_space<vmem>>, vector<1x32xf32>
    %56 = vector.broadcast %55 : vector<1x32xf32> to vector<16x32xf32>
    %57 = arith.mulf %3, %56 : vector<16x32xf32>
    %58 = arith.addf %54, %57 : vector<16x32xf32>
    %c15 = arith.constant 15 : index
    %c0_31 = arith.constant 0 : index
    %59 = vector.load %arg3[%c15, %c0_31] : memref<21x32xf32, #tpu.memory_space<vmem>>, vector<1x32xf32>
    %60 = vector.broadcast %59 : vector<1x32xf32> to vector<16x32xf32>
    %61 = arith.mulf %5, %60 : vector<16x32xf32>
    %62 = arith.addf %58, %61 : vector<16x32xf32>
    %c19_32 = arith.constant 19 : index
    %c0_33 = arith.constant 0 : index
    %63 = vector.load %arg3[%c19_32, %c0_33] : memref<21x32xf32, #tpu.memory_space<vmem>>, vector<1x32xf32>
    %64 = vector.broadcast %63 : vector<1x32xf32> to vector<16x32xf32>
    %65 = arith.addf %62, %64 : vector<16x32xf32>
    %66 = tpu.concatenate %51, %65 in 1 : vector<16x32xf32>, vector<16x32xf32> -> vector<16x64xf32>
    %c0_34 = arith.constant 0 : index
    %c1_35 = arith.constant 1 : index
    %c0_36 = arith.constant 0 : index
    %c0_37 = arith.constant 0 : index
    %67 = vector.load %arg4[%c0_34, %c1_35, %c0_36, %c0_37] : memref<1x3x16x64xf32, #tpu.memory_space<vmem>>, vector<1x1x16x64xf32>
    %68 = vector.shape_cast %67 : vector<1x1x16x64xf32> to vector<16x64xf32>
    %69 = vector.shape_cast %66 : vector<16x64xf32> to vector<1x1x16x64xf32>
    tpu.vector_store %arg4[%c0_34, %c1_35, %c0_36, %c0_37], %69 {strides = array<i32>} : memref<1x3x16x64xf32, #tpu.memory_space<vmem>>, vector<1x1x16x64xf32>,
    %c4 = arith.constant 4 : index
    %c0_38 = arith.constant 0 : index
    %70 = vector.load %arg3[%c4, %c0_38] : memref<21x32xf32, #tpu.memory_space<vmem>>, vector<1x32xf32>
    %71 = vector.broadcast %70 : vector<1x32xf32> to vector<16x32xf32>
    %72 = arith.mulf %1, %71 : vector<16x32xf32>
    %c10 = arith.constant 10 : index
    %c0_39 = arith.constant 0 : index
    %73 = vector.load %arg3[%c10, %c0_39] : memref<21x32xf32, #tpu.memory_space<vmem>>, vector<1x32xf32>
    %74 = vector.broadcast %73 : vector<1x32xf32> to vector<16x32xf32>
    %75 = arith.mulf %3, %74 : vector<16x32xf32>
    %76 = arith.addf %72, %75 : vector<16x32xf32>
    %c16 = arith.constant 16 : index
    %c0_40 = arith.constant 0 : index
    %77 = vector.load %arg3[%c16, %c0_40] : memref<21x32xf32, #tpu.memory_space<vmem>>, vector<1x32xf32>
    %78 = vector.broadcast %77 : vector<1x32xf32> to vector<16x32xf32>
    %79 = arith.mulf %5, %78 : vector<16x32xf32>
    %80 = arith.addf %76, %79 : vector<16x32xf32>
    %c20 = arith.constant 20 : index
    %c0_41 = arith.constant 0 : index
    %81 = vector.load %arg3[%c20, %c0_41] : memref<21x32xf32, #tpu.memory_space<vmem>>, vector<1x32xf32>
    %82 = vector.broadcast %81 : vector<1x32xf32> to vector<16x32xf32>
    %83 = arith.addf %80, %82 : vector<16x32xf32>
    %c5 = arith.constant 5 : index
    %c0_42 = arith.constant 0 : index
    %84 = vector.load %arg3[%c5, %c0_42] : memref<21x32xf32, #tpu.memory_space<vmem>>, vector<1x32xf32>
    %85 = vector.broadcast %84 : vector<1x32xf32> to vector<16x32xf32>
    %86 = arith.mulf %1, %85 : vector<16x32xf32>
    %c11 = arith.constant 11 : index
    %c0_43 = arith.constant 0 : index
    %87 = vector.load %arg3[%c11, %c0_43] : memref<21x32xf32, #tpu.memory_space<vmem>>, vector<1x32xf32>
    %88 = vector.broadcast %87 : vector<1x32xf32> to vector<16x32xf32>
    %89 = arith.mulf %3, %88 : vector<16x32xf32>
    %90 = arith.addf %86, %89 : vector<16x32xf32>
    %c17 = arith.constant 17 : index
    %c0_44 = arith.constant 0 : index
    %91 = vector.load %arg3[%c17, %c0_44] : memref<21x32xf32, #tpu.memory_space<vmem>>, vector<1x32xf32>
    %92 = vector.broadcast %91 : vector<1x32xf32> to vector<16x32xf32>
    %93 = arith.mulf %5, %92 : vector<16x32xf32>
    %94 = arith.addf %90, %93 : vector<16x32xf32>
    %c20_45 = arith.constant 20 : index
    %c0_46 = arith.constant 0 : index
    %95 = vector.load %arg3[%c20_45, %c0_46] : memref<21x32xf32, #tpu.memory_space<vmem>>, vector<1x32xf32>
    %96 = vector.broadcast %95 : vector<1x32xf32> to vector<16x32xf32>
    %97 = arith.addf %94, %96 : vector<16x32xf32>
    %98 = tpu.concatenate %83, %97 in 1 : vector<16x32xf32>, vector<16x32xf32> -> vector<16x64xf32>
    %c0_47 = arith.constant 0 : index
    %c2_48 = arith.constant 2 : index
    %c0_49 = arith.constant 0 : index
    %c0_50 = arith.constant 0 : index
    %99 = vector.load %arg4[%c0_47, %c2_48, %c0_49, %c0_50] : memref<1x3x16x64xf32, #tpu.memory_space<vmem>>, vector<1x1x16x64xf32>
    %100 = vector.shape_cast %99 : vector<1x1x16x64xf32> to vector<16x64xf32>
    %101 = vector.shape_cast %98 : vector<16x64xf32> to vector<1x1x16x64xf32>
    tpu.vector_store %arg4[%c0_47, %c2_48, %c0_49, %c0_50], %101 {strides = array<i32>} : memref<1x3x16x64xf32, #tpu.memory_space<vmem>>, vector<1x1x16x64xf32>,
    return
  }
  func.func @transform_0(%arg0: i32, %arg1: i32) -> (i32, i32, i32, i32) {
    %c0_i32 = arith.constant 0 : i32
    %c0_i32_0 = arith.constant 0 : i32
    %c0_i32_1 = arith.constant 0 : i32
    return %arg0, %c0_i32, %arg1, %c0_i32_0 : i32, i32, i32, i32
  }
  func.func @transform_1(%arg0: i32, %arg1: i32) -> (i32, i32) {
    %c0_i32 = arith.constant 0 : i32
    %c0_i32_0 = arith.constant 0 : i32
    %c0_i32_1 = arith.constant 0 : i32
    return %c0_i32, %c0_i32_0 : i32, i32
  }
  func.func @transform_2(%arg0: i32, %arg1: i32) -> (i32, i32, i32, i32) {
    %c0_i32 = arith.constant 0 : i32
    %c0_i32_0 = arith.constant 0 : i32
    %c0_i32_1 = arith.constant 0 : i32
    return %arg0, %c0_i32, %arg1, %c0_i32_0 : i32, i32, i32, i32
  }
}

</mosaic_0001>

<bundles_post_ra>
// kernel: tpu_custom_call.1
= control target key start
LH: loop header
LB: loop body
LE: loop exit
PB: predicated region body
PF: predicated region fallthrough
CT: control target
= control target key end

     0   :  { %7 = vsyncpa [#allocation3], 0  ;;  %s1121_s0 = inlined_call_operand.hbm [shape: f32[2,3,16,32], index: 0, kind: input, shape index: {}]   ;;  %s1122_s1 = inlined_call_operand.hbm [shape: f32[21,32], index: 1, kind: input, shape index: {}]   ;;  %s1123_s2 = inlined_call_operand.hbm [shape: f32[2,3,16,64], index: 2, kind: output, shape index: {}]  }
   0x1   :  { %9 = vsyncpa [#allocation3 + $0x1], 0 }
   0x2   :  { %10 = vsyncpa [#allocation6], 0 }
   0x3   :  { %11 = vsyncpa [#allocation4], 0 }
   0x4   :  { %13 = vsyncpa [#allocation4 + $0x1], 0  ;;  %s826_s9 = smov 0   ;;  %s828_s10 = smov 0  }
   0x5   :  { %s830_s11 = smov 0   ;;  %s832_s12 = smov 0  }
   0x6   :  { %s834_s13 = smov 0   ;;  %s836_s14 = smov 0  }
   0x7 LB: > { %s535_s15 = sadd.s32 4294967295, %s801_s14   ;;  %s536_s16 = sadd.s32 4294967294, %s801_s14   ;;  %s801_s14 = sphi %s836_s14, %s19_s14   ;;  %s797_s13 = sphi %s834_s13, %s1146_s13   ;;  %s793_s12 = sphi %s832_s12, %s1145_s12   ;;  %s789_s11 = sphi %s830_s11, %s1144_s11   ;;  %s785_s10 = sphi %s828_s10, %s1143_s10   ;;  %s781_s9 = sphi %s826_s9, %s1142_s9  }
   0x8   : > { %p53_p0 = scmp.ne.s32.totalorder %s785_s10, %s781_s9  ;;  %p860_p1 = scmp.eq.s32.totalorder %s535_s15, 0 }
   0x9   : > { %p864_p2 = scmp.eq.s32.totalorder %s535_s15, 1  ;;  %p106_p3 = scmp.eq.s32.totalorder %s536_s16, 1 }
   0xa   : > { %s1128_s17 = scalar_select %p860_p1, 1, 0 }
   0xb   : > { %s1129_s18 = scalar_select %p864_p2, 1, 0 }
   0xc   : > { %p870_p4 = por %p860_p1, %p53_p0  ;;  %p537_p5 = scmp.ge.s32.totalorder %s801_s14, 1 }
   0xd   : > { %p875_p6 = por %p106_p3, %p53_p0  ;;  %p113_p7 = scmp.lt.s32.totalorder %s801_s14, 3 }
   0xe   : > { %s1130_s19 = scalar_select %p870_p4, 1, 0 }
   0xf   : > { %s1131_s20 = scalar_select %p875_p6, 1, 0 }
  0x10   : > { %p880_p8 = pnand %p537_p5, %p113_p7  ;;  %s803_s22 = smov [#allocation5]  }
  0x11   : > { %s125_s23 = sshll.u32 %s803_s22, 4  ;;  %s31_s25 = sadd.s32 1, %s797_s13  ;;  %s126_s23 = int_to_ptr.vmem [resolvable:$true] %s125_s23 }
  0x12   : > { %s1132_s21 = scalar_select %p880_p8, 1, 0 }
  0x13   : > { %p587_p9 = pneg %p880_p8  ;;  %s657_s28 = scalar_lea.hbm %s1122_s1, 384 }
  0x14   : > { %p658_p12 = scmp.ne.s32.totalorder %s1122_s1, %s657_s28  ;;  %p664_p5 = scmp.lt.u32.totalorder %s657_s28, %s1122_s1 }
  0x15   : > { %p889_p11 = pnand %p587_p9, %p860_p1 }
  0x17   : > { %p659_p13 = pneg %p889_p11 }
  0x19   : > { %p660_p0 = pnand %p659_p13, %p658_p12 }
  0x1b   : > { %p661_p3 = pneg %p660_p0 }
  0x1d   : > { %p666_p7 = pnand %p664_p5, %p661_p3 }
  0x1f   : > { %669 = shalt.err (!%p666_p7)
}
  0x20   : > { %s670_s5 = scalar_lea.vmem %s126_s23, 384  ;;  %p678_p1 = scmp.lt.s32.totalorder %s126_s23, %s126_s23 }
  0x21   : > { %p671_p9 = scmp.ne.s32.totalorder %s126_s23, %s670_s5  ;;  %p679_p4 = scmp.lt.s32.totalorder %s670_s5, %s670_s5 }
  0x23   : > { %p673_p10 = pnand %p671_p9, %p659_p13  ;;  %p680_p8 = por %p679_p4, %p678_p1 }
  0x25   : > { %p674_p6 = pneg %p673_p10 }
  0x27   : > { %p681_p2 = pnand %p680_p8, %p674_p6 }
  0x29   : > { %684 = shalt.err (!%p681_p2)
}
  0x2a   : > { %s804_s6 = smov 128   ;;  %s805_s7 = smov 8  }
  0x2b   : > { %590 = dma.hbm_to_vmem [thread:$0]  (!%p889_p11), %s1122_s1, 384, %s126_s23, [#allocation6], %s804_s6, %s804_s6, %s805_s7  }
  0x2c   : > { %p33_p1 = scmp.ge.s32.totalorder %s31_s25, 2  ;;  %s40_s16 = sadd.s32 1, %s789_s11 }
  0x2d   : > { %p47_p2 = scmp.ne.s32.totalorder %s789_s11, %s785_s10  ;;  %p48_p4 = scmp.eq.s32.totalorder %s801_s14, 0 }
  0x2e   : > { %s1148_s25 = smov (%p33_p1, %s31_s25), 0  ;;  %p1134_p8 = scmp.ne.s32.totalorder %s1129_s18, 0 }
  0x2f   : > { %p49_p6 = por %p48_p4, %p47_p2  ;;  %s35_s24 = ssub.s32 %s797_s13, %s1148_s25 }
  0x30   : > { %p921_p10 = por %p1134_p8, %p47_p2  ;;  %p600_p12 = scmp.lt.s32.totalorder %s801_s14, 2 }
  0x31   : > { %p38_p13 = scmp.eq.s32.totalorder %s35_s24, 0  ;;  %s139_s26 = sand.u32 1, %s789_s11  }
  0x32   : > { %s575_s27 = smul.u32 48, %s139_s26  ;;  %p933_p11 = pnand %p600_p12, %p49_p6 }
  0x33   : > { %s930_s28 = scalar_select %p38_p13, %s789_s11, %s40_s16  }
  0x34   : > { %s576_s23 = smul.u32 768, %s797_s13  ;;  %s143_s29 = scalar_lea.vmem [#allocation2], %s575_s27 }
  0x35   : > { %s152_s30 = sshll.u32 %s143_s29, 4  ;;  %s944_s8 = scalar_lea.sflag [#allocation3], %s139_s26  ;;  %s942_s30 = int_to_ptr.vmem [resolvable:$true] %s152_s30 }
  0x36   : > { %s940_s5 = scalar_lea.hbm %s1121_s0, %s576_s23  ;;  %p687_p3 = pneg %p933_p11 }
  0x37   : > { %s685_s15 = scalar_lea.hbm %s940_s5, 768  ;;  %s690_s27 = scalar_lea.hbm %s1121_s0, 1536 }
  0x38   : > { %p686_p0 = scmp.ne.s32.totalorder %s940_s5, %s685_s15  ;;  %p691_p9 = scmp.lt.u32.totalorder %s940_s5, %s1121_s0 }
  0x39   : > { %p692_p1 = scmp.lt.u32.totalorder %s690_s27, %s685_s15  ;;  %p694_p4 = scmp.lt.u32.totalorder %s685_s15, %s940_s5 }
  0x3a   : > { %p688_p5 = pnand %p687_p3, %p686_p0 }
  0x3b   : > { %p693_p2 = por %p692_p1, %p691_p9 }
  0x3c   : > { %p689_p7 = pneg %p688_p5 }
  0x3d   : > { %p695_p6 = por %p694_p4, %p693_p2 }
  0x3f   : > { %p696_p8 = pnand %p695_p6, %p689_p7 }
  0x41   : > { %699 = shalt.err (!%p696_p8)
}
  0x42   : > { %s700_s26 = scalar_lea.vmem %s942_s30, 768  ;;  %s806_s4 = smov [#allocation2]  }
  0x43   : > { %p701_p12 = scmp.ne.s32.totalorder %s942_s30, %s700_s26  ;;  %s705_s18 = sshll.u32 %s806_s4, 4  ;;  %s706_s18 = int_to_ptr.vmem [resolvable:$false] %s705_s18 }
  0x44   : > { %s707_s16 = scalar_lea.vmem %s706_s18, 1536  ;;  %p708_p5 = scmp.lt.s32.totalorder %s942_s30, %s706_s18 }
  0x45   : > { %p703_p13 = pnand %p701_p12, %p687_p3  ;;  %p709_p9 = scmp.lt.s32.totalorder %s707_s16, %s700_s26 }
  0x47   : > { %p704_p0 = pneg %p703_p13  ;;  %p710_p1 = por %p709_p9, %p708_p5 }
  0x49   : > { %p711_p2 = pnand %p710_p1, %p704_p0 }
  0x4b   : > { %714 = shalt.err (!%p711_p2)
}
  0x4c   : > { %594 = dma.hbm_to_vmem [thread:$0]  (!%p933_p11), %s940_s5, 768, %s942_s30, %s944_s8, %s804_s6, %s804_s6, %s805_s7  }
  0x4d   : > { %p1137_p3 = scmp.ne.s32.totalorder %s1132_s21, 0 }
  0x4e   : > { %s978_s15 = sand.u32 (!%p1137_p3), 1, %s785_s10   ;;  %p1138_p7 = scmp.ne.s32.totalorder (!%p1137_p3), %s1130_s19, 0 }
  0x4f   : > { %164 = sbr.rel (%p1137_p3) target bundleno = 242 (0xf2), region = 28  ;;  %s167_s27 = scalar_lea.sflag (!%p1137_p3), [#allocation3], %s978_s15 }
  0x50   : > { %s577_s24 = smul.u32 (!%p1137_p3), 48, %s978_s15 }
  0x52   : > { %s170_s3 = scalar_lea.vmem (!%p1137_p3), [#allocation2], %s577_s24 }
  0x56   : > { %768 = dma.done.wait (%p1138_p7), %s167_s27, 768  }
  0x57   : > { %770 = vsyncadd (%p1138_p7), %s167_s27, 4294966528  ;;  %p1139_p11 = scmp.ne.s32.totalorder %s1128_s17, 0 }
  0x59   : > { %772 = dma.done.wait (%p1139_p11), [#allocation6], 384  }
  0x5a   : > { %774 = vsyncadd (%p1139_p11), [#allocation6], 4294966912  ;;  %v992_v0 = vld [vmem:[%s170_s3] sm:$0xff]  ;;  %v994_v1 = vld [vmem:[%s170_s3 + $0x8] sm:$0xff]  ;;  %s807_s17 = smov 32   ;;  %vm272_vm0 = vcmask 261120  }
  0x5b   : > { %v996_v2 = vld [vmem:[%s170_s3 + $0x10] sm:$0xff]  ;;  %v998_v3 = vld [vmem:[%s170_s3 + $0x18] sm:$0xff]  ;;  %v1000_v4 = vld [vmem:[%s170_s3 + $0x20] sm:$0xff]  ;;  %vm275_vm1 = vcmask 523264   ;;  %s194_s19 = scalar_lea.vmem [#allocation7], %s577_s24  ;;  %s578_s6 = smul.u32 768, %s793_s12 }
  0x5c   : > { %v1002_v5 = vld [vmem:[%s170_s3 + $0x28] sm:$0xff]  ;;  %v558_v6 = vld [vmem:[#allocation5 + $0x3] ss:$0 sm:$0xff]  ;;  %v551_v13 = vld [vmem:[#allocation5 + $0x1] ss:$0 sm:$0xff]  ;;  %s438_s21 = sshll.u32 %s194_s19, 4  ;;  %s1062_s21 = int_to_ptr.vmem [resolvable:$true] %s438_s21 }
  0x5d   : > { %v559_v7 = vld [vmem:[#allocation5 + $0x9] ss:$0 sm:$0xff]  ;;  %v315_v8 = vmul.f32 %v558_v6, %v992_v0  ;;  %v316_v9 = vmul.f32 %v558_v6, %v994_v1  ;;  %v560_v12 = vld [vmem:[#allocation5 + $0xf] ss:$0 sm:$0xff]  ;;  %v242_v16 = vmul.f32 %v551_v13, %v992_v0  ;;  %v243_v17 = vmul.f32 %v551_v13, %v994_v1  ;;  %v552_v18 = vld [vmem:[#allocation5 + $0x7] ss:$0 sm:$0xff]  ;;  %s1070_s5 = scalar_lea.hbm %s1123_s2, %s578_s6 }
  0x5e   : > { %v322_v10 = vmul.f32 %v559_v7, %v996_v2  ;;  %v323_v11 = vmul.f32 %v559_v7, %v998_v3  ;;  %v331_v14 = vmul.f32 %v560_v12, %v1000_v4  ;;  %v332_v15 = vmul.f32 %v560_v12, %v1002_v5  ;;  %v553_v19 = vld [vmem:[#allocation5 + $0xd] ss:$0 sm:$0xff]  ;;  %v567_v24 = vld [vmem:[#allocation5 + $0x5] ss:$0 sm:$0xff]  ;;  %v568_v25 = vld [vmem:[#allocation5 + $0xb] ss:$0 sm:$0xff] }
  0x5f   : > { %v249_v21 = vmul.f32 %v552_v18, %v996_v2  ;;  %v250_v22 = vmul.f32 %v552_v18, %v998_v3  ;;  %v258_v23 = vmul.f32 %v553_v19, %v1000_v4  ;;  %v569_v26 = vld [vmem:[#allocation5 + $0x11] ss:$0 sm:$0xff]  ;;  %v1015_v27 = vld [vmem:[#allocation5 + $0x13] ss:$0 sm:$0xff]  ;;  %v259_v28 = vmul.f32 %v553_v19, %v1002_v5  ;;  %v555_v36 = vld [vmem:[#allocation5 + $0x8] ss:$0 sm:$0xff] }
  0x60   : > { %v324_v20 = vadd.f32 %v322_v10, %v315_v8  ;;  %v325_v29 = vadd.f32 %v323_v11, %v316_v9  ;;  %v388_v30 = vmul.f32 %v567_v24, %v994_v1  ;;  %v395_v31 = vmul.f32 %v568_v25, %v998_v3  ;;  %v550_v37 = vld [vmem:[#allocation5 + $0x12] ss:$0 sm:$0xff]  ;;  %v554_v42 = vld [vmem:[#allocation5 + $0x2] ss:$0 sm:$0xff]  ;;  %v556_v43 = vld [vmem:[#allocation5 + $0xe] ss:$0 sm:$0xff] }
  0x61   : > { %v251_v33 = vadd.f32 %v249_v21, %v242_v16  ;;  %v252_v34 = vadd.f32 %v250_v22, %v243_v17  ;;  %v404_v35 = vmul.f32 %v569_v26, %v1002_v5  ;;  %v387_v40 = vmul.f32 %v567_v24, %v992_v0  ;;  %v566_v47 = vld [vmem:[#allocation5 + $0x14] ss:$0 sm:$0xff]  ;;  %v548_v49 = vld [vmem:[#allocation5 + $0x6] ss:$0 sm:$0xff]  ;;  %v549_v50 = vld [vmem:[#allocation5 + $0xc] ss:$0 sm:$0xff] }
  0x62   : > { %v333_v32 = vadd.f32 %v331_v14, %v324_v20  ;;  %v334_v38 = vadd.f32 %v332_v15, %v325_v29  ;;  %v397_v39 = vadd.f32 %v395_v31, %v388_v30  ;;  %v394_v41 = vmul.f32 %v568_v25, %v996_v2  ;;  %v547_v55 = vld [vmem:[#allocation5] ss:$0 sm:$0xff]  ;;  %v563_v10 = vld [vmem:[#allocation5 + $0x4] ss:$0 sm:$0xff]  ;;  %v564_v11 = vld [vmem:[#allocation5 + $0xa] ss:$0 sm:$0xff] }
  0x63   : > { %v260_v45 = vadd.f32 %v258_v23, %v251_v33  ;;  %v261_v46 = vadd.f32 %v259_v28, %v252_v34  ;;  %v403_v48 = vmul.f32 %v569_v26, %v1000_v4  ;;  %v290_v54 = vmul.f32 %v555_v36, %v996_v2  ;;  %v565_v12 = vld [vmem:[#allocation5 + $0x10] ss:$0 sm:$0xff]  ;;  %s423_s12 = scalar_lea.sflag [#allocation4], %s978_s15  ;;  %s715_s8 = scalar_lea.vmem %s1062_s21, 768 }
  0x64   : > { %v335_v44 = vadd.f32 %v1015_v27, %v333_v32  ;;  %v336_v51 = vadd.f32 %v1015_v27, %v334_v38  ;;  %v406_v52 = vadd.f32 %v404_v35, %v397_v39  ;;  %v396_v53 = vadd.f32 %v394_v41, %v387_v40  ;;  %p716_p4 = scmp.ne.s32.totalorder %s1062_s21, %s715_s8  ;;  %s808_s23 = smov [#allocation7]  }
  0x65   : > { %v262_v56 = vadd.f32 %v550_v37, %v260_v45  ;;  %v263_v57 = vadd.f32 %v550_v37, %v261_v46  ;;  %v299_v58 = vmul.f32 %v556_v43, %v1000_v4  ;;  %v283_v59 = vmul.f32 %v554_v42, %v992_v0  ;;  %s719_s29 = sshll.u32 %s808_s23, 4  ;;  %s720_s29 = int_to_ptr.vmem [resolvable:$false] %s719_s29 }
  0x66   : > { %339 = vrot.lane.b32.xlu1 %v335_v44, %s807_s17  ;;  %v408_v60 = vadd.f32 %v566_v47, %v406_v52  ;;  %v405_v61 = vadd.f32 %v403_v48, %v396_v53  ;;  %v217_v62 = vmul.f32 %v548_v49, %v996_v2  ;;  %v226_v63 = vmul.f32 %v549_v50, %v1000_v4  ;;  %p717_p6 = pnand %p716_p4, %p921_p10  ;;  %s721_s26 = scalar_lea.vmem %s720_s29, 1536 }
  0x67   : > { %266 = vrot.lane.b32.xlu0 %v262_v56, %s807_s17  ;;  %v292_v6 = vadd.f32 %v290_v54, %v283_v59  ;;  %v210_v7 = vmul.f32 %v547_v55, %v992_v0  ;;  %v284_v8 = vmul.f32 %v554_v42, %v994_v1  ;;  %v291_v9 = vmul.f32 %v555_v36, %v998_v3  ;;  %p722_p12 = scmp.lt.s32.totalorder %s1062_s21, %s720_s29  ;;  %p723_p13 = scmp.lt.s32.totalorder %s721_s26, %s715_s8 }
  0x68   : > { %v407_v13 = vadd.f32 %v566_v47, %v405_v61  ;;  %v300_v14 = vmul.f32 %v556_v43, %v1002_v5  ;;  %v211_v15 = vmul.f32 %v547_v55, %v994_v1  ;;  %v218_v16 = vmul.f32 %v548_v49, %v998_v3  ;;  %p718_p8 = pneg %p717_p6 }
  0x69   : > { %v301_v17 = vadd.f32 %v299_v58, %v292_v6  ;;  %v219_v18 = vadd.f32 %v217_v62, %v210_v7  ;;  %v293_v19 = vadd.f32 %v291_v9, %v284_v8  ;;  %v227_v20 = vmul.f32 %v549_v50, %v1002_v5  ;;  %p724_p0 = por %p723_p13, %p722_p12 }
  0x6a   : > { %341 = vrot.lane.b32.xlu1 %v336_v51, %s807_s17  ;;  %v220_v21 = vadd.f32 %v218_v16, %v211_v15  ;;  %v356_v22 = vmul.f32 %v563_v10, %v994_v1  ;;  %v363_v23 = vmul.f32 %v564_v11, %v998_v3  ;;  %v372_v24 = vmul.f32 %v565_v12, %v1002_v5 }
  0x6b   : > { %268 = vrot.lane.b32.xlu0 %v263_v57, %s807_s17  ;;  %v308_v25 = vadd.f32 %v1015_v27, %v301_v17  ;;  %v228_v26 = vadd.f32 %v226_v63, %v219_v18  ;;  %v302_v28 = vadd.f32 %v300_v14, %v293_v19  ;;  %v355_v29 = vmul.f32 %v563_v10, %v992_v0  ;;  %p725_p5 = pnand %p724_p0, %p718_p8 }
  0x6c   : > { %v229_v30 = vadd.f32 %v227_v20, %v220_v21  ;;  %v365_v31 = vadd.f32 %v363_v23, %v356_v22  ;;  %v362_v32 = vmul.f32 %v564_v11, %v996_v2  ;;  %v371_v33 = vmul.f32 %v565_v12, %v1000_v4 }
  0x6d   : > { %v235_v1 = vadd.f32 %v550_v37, %v228_v26  ;;  %v309_v3 = vadd.f32 %v1015_v27, %v302_v28 }
  0x6e   : > { %413 = vrot.lane.b32.xlu1 %v408_v60, %s807_s17  ;;  %v236_v5 = vadd.f32 %v550_v37, %v229_v30  ;;  %v374_v34 = vadd.f32 %v372_v24, %v365_v31  ;;  %v364_v35 = vadd.f32 %v362_v32, %v355_v29 }
  0x6f   : > { %411 = vrot.lane.b32.xlu0 %v407_v13, %s807_s17 }
  0x70   : > { %v381_v36 = vadd.f32 %v566_v47, %v374_v34  ;;  %v373_v38 = vadd.f32 %v371_v33, %v364_v35 }
  0x72   : > { %v380_v0 = vadd.f32 %v566_v47, %v373_v38 }
  0xd8   : > { %v340_v2 = vpop.permute.xlu1 %339 }
  0xd9   : > { %v345_v39 = vsel %vm272_vm0, %v308_v25, %v340_v2  ;;  %v267_v4 = vpop.permute.xlu0 %266 }
  0xda   : > { %561 = vst.msk [vmem:[%s194_s19 + $0x10] sm:$0xff] %vm275_vm1, %v345_v39  ;;  %v273_v27 = vsel %vm272_vm0, %v235_v1, %v267_v4 }
  0xdb   : > { %276 = vst.msk [vmem:[%s194_s19] sm:$0xff] %vm275_vm1, %v273_v27 }
  0xdc   : > { %v342_v37 = vpop.permute.xlu1 %341 }
  0xdd   : > { %v346_v40 = vsel %vm272_vm0, %v309_v3, %v342_v37  ;;  %v269_v41 = vpop.permute.xlu0 %268 }
  0xde   : > { %562 = vst.msk [vmem:[%s194_s19 + $0x18] sm:$0xff] %vm275_vm1, %v346_v40  ;;  %v274_v42 = vsel %vm272_vm0, %v236_v5, %v269_v41 }
  0xdf   : > { %277 = vst.msk [vmem:[%s194_s19 + $0x8] sm:$0xff] %vm275_vm1, %v274_v42 }
  0xe0   : > { %v414_v43 = vpop.permute.xlu1 %413 }
  0xe1   : > { %v418_v44 = vsel %vm272_vm0, %v381_v36, %v414_v43  ;;  %v412_v45 = vpop.permute.xlu0 %411 }
  0xe2   : > { %571 = vst.msk [vmem:[%s194_s19 + $0x28] sm:$0xff] %vm275_vm1, %v418_v44  ;;  %v417_v46 = vsel %vm272_vm0, %v380_v0, %v412_v45 }
  0xe3   : > { %570 = vst.msk [vmem:[%s194_s19 + $0x20] sm:$0xff] %vm275_vm1, %v417_v46 }
  0xe4   : > { %728 = shalt.err (!%p725_p5)
}
  0xe5   : > { %s729_s4 = scalar_lea.hbm %s1070_s5, 768  ;;  %s733_s24 = scalar_lea.hbm %s1123_s2, 1536 }
  0xe6   : > { %p730_p9 = scmp.ne.s32.totalorder %s1070_s5, %s729_s4  ;;  %p734_p3 = scmp.lt.u32.totalorder %s1070_s5, %s1123_s2 }
  0xe7   : > { %p735_p7 = scmp.lt.u32.totalorder %s733_s24, %s729_s4  ;;  %p737_p4 = scmp.lt.u32.totalorder %s729_s4, %s1070_s5 }
  0xe8   : > { %p731_p1 = pnand %p730_p9, %p921_p10 }
  0xe9   : > { %p736_p11 = por %p735_p7, %p734_p3 }
  0xea   : > { %p732_p2 = pneg %p731_p1 }
  0xeb   : > { %p738_p6 = por %p737_p4, %p736_p11 }
  0xed   : > { %p739_p8 = pnand %p738_p6, %p732_p2 }
  0xef   : > { %742 = shalt.err (!%p739_p8)
}
  0xf0   : > { %s809_s17 = smov 128   ;;  %s810_s19 = smov 8  }
  0xf1   : > { %585 = dma.vmem_to_hbm [thread:$0]  (%p921_p10), %s1062_s21, 768, %s1070_s5, %s423_s12, %s809_s17, %s809_s17, %s810_s19  }
  0xf2 PF: > { %s453_s6 = sand.u32 1, %s781_s9   ;;  %p1140_p12 = scmp.ne.s32.totalorder %s1131_s20, 0 }
  0xf3   : > { %p1141_p13 = scmp.ge.s32.totalorder %s801_s14, 2  ;;  %s454_s7 = scalar_lea.sflag [#allocation4], %s453_s6 }
  0xf5   : > { %p596_p0 = pnand %p1141_p13, %p1140_p12 }
  0xf7   : > { %776 = dma.done.wait (!%p596_p0), %s454_s7, 768  }
  0xf8   : > { %778 = vsyncadd (!%p596_p0), %s454_s7, 4294966528  ;;  %s19_s14 = sadd.s32 1, %s801_s14   ;;  %s1142_s9 = smov %s785_s10 }
  0xf9   : > { %p16_p5 = scmp.ge.s32.totalorder %s19_s14, 4   ;;  %s1143_s10 = smov %s789_s11 }
  0xfa   : > { %s1144_s11 = smov %s930_s28  ;;  %s1145_s12 = smov %s797_s13 }
  0xfb   : > { %s1146_s13 = smov %s1148_s25  ;;  %18 = sbr.rel (!%p16_p5) target bundleno = 7 (0x7), region = 81 }
 0x102   :  { %459 = vsyncpa [#allocation3], 1 }
 0x103   :  { %461 = vsyncpa [#allocation3 + $0x1], 1 }
 0x104   :  { %462 = vsyncpa [#allocation6], 1 }
 0x105   :  { %463 = vsyncpa [#allocation4], 1 }
 0x106   :  { %465 = vsyncpa [#allocation4 + $0x1], 1 }

</bundles_post_ra>
